<compile_context>
chip_gen: v7x
topology: tpu7x:2x2x1
jax: 0.10.0
libtpu: 0.0.40
codegen_flags: <defaults>
</compile_context>

<pallas_src>
import jax
import jax.numpy as jnp
from jax.experimental import pallas as pl
from jax.experimental.pallas import tpu as pltpu

NEG_SLOPE = 0.01   # PyTorch F.leaky_relu default negative_slope


def _leaky_relu(x):
    # identical to where(x >= 0, x, 0.01 * x) for slope < 1
    return jnp.maximum(x, NEG_SLOPE * x)


def _cdiv(a, b):
    return -(-a // b)


def _round_up(a, m):
    return _cdiv(a, m) * m


def make_entire_estimator_kernel(num_final_fcs):
    def kernel(attr_ref, sptm_ref, w_in_a_ref, w_in_s_ref, b_in_ref,
               w_res_ref, b_res_ref, w_out_ref, b_out_ref, out_ref):
        # --- input2hid on cat(attr, sptm): concat fused into the matmul by
        #     splitting the weight rows -> two bf16 MXU dots, f32 accumulation.
        h = jnp.dot(attr_ref[...], w_in_a_ref[...],
                    preferred_element_type=jnp.float32)
        h = h + jnp.dot(sptm_ref[...], w_in_s_ref[...],
                        preferred_element_type=jnp.float32)
        h = _leaky_relu(h + b_in_ref[...])                    # h stays f32

        # --- residual fc stack (statically unrolled; weights VMEM-resident).
        #     MXU operands are bf16, accumulation and the residual add are f32.
        for i in range(num_final_fcs):
            r = jnp.dot(h.astype(jnp.bfloat16), w_res_ref[i],
                        preferred_element_type=jnp.float32) + b_res_ref[i]
            h = h + _leaky_relu(r)

        # --- hid2out: per-row dot product on the VPU (broadcast multiply);
        #     the (tb, H) -> (H, tb) transpose and the sublane reduction run on
        #     the otherwise-idle XLU, yielding a lane-dense (1, tb) row and a
        #     single contiguous tb*4 B store per step (no 128x padded matmul /
        #     write amplification).
        prod_t = jnp.transpose(h * w_out_ref[...])            # (H, tb) f32
        row = jnp.sum(prod_t, axis=0, keepdims=True) + b_out_ref[...]  # (1, tb)
        out_ref[...] = row[None]                              # (1, 1, tb)

    return kernel


def entire_estimator_forward(attr_t, sptm_t, params, *, block_rows=None):
    # MXU-facing activations in bf16 (no f32 upcast of the inputs); halves the
    # per-row input DMA bytes. Accumulation stays f32 inside the kernel.
    attr_t = attr_t.astype(jnp.bfloat16)
    sptm_t = sptm_t.astype(jnp.bfloat16)
    B, attr_dim = attr_t.shape
    _, sptm_dim = sptm_t.shape

    w_in = params["w_in"]          # (attr_dim + sptm_dim, H)
    b_in = params["b_in"]          # (H,)
    w_res = params["w_res"]        # (L, H, H)
    b_res = params["b_res"]        # (L, H)
    w_out = params["w_out"]        # (H, 1)
    b_out = params["b_out"]        # (1,)
    H = w_in.shape[1]
    L = w_res.shape[0]

    # Split input2hid weight along the input axis (fuses the concat) and cast
    # the MXU operands to bf16; biases and the tiny hid2out vector stay f32.
    w_in_a = w_in[:attr_dim].astype(jnp.bfloat16)
    w_in_s = w_in[attr_dim:].astype(jnp.bfloat16)
    w_res_b = w_res.astype(jnp.bfloat16)
    b_in2 = b_in.reshape(1, H).astype(jnp.float32)
    b_res3 = b_res.reshape(L, 1, H).astype(jnp.float32)
    w_out_row = w_out.reshape(1, H).astype(jnp.float32)
    b_out_11 = b_out.reshape(1, 1).astype(jnp.float32)

    # Pad the (small) feature dims to multiples of 16 so the bf16 tiles /
    # matmul K dims are sublane-aligned; the zero rows/cols contribute nothing.
    A = _round_up(attr_dim, 16)
    if A != attr_dim:
        attr_t = jnp.pad(attr_t, ((0, 0), (0, A - attr_dim)))
        w_in_a = jnp.pad(w_in_a, ((0, A - attr_dim), (0, 0)))
    S = _round_up(sptm_dim, 16)
    if S != sptm_dim:
        sptm_t = jnp.pad(sptm_t, ((0, 0), (0, S - sptm_dim)))
        w_in_s = jnp.pad(w_in_s, ((0, S - sptm_dim), (0, 0)))

    # Grid shaping: pick the number of steps first (>= 4 so the pipeline can
    # double-buffer, and even so v7x's two TensorCores both get work), then
    # derive the batch tile from it so padding stays < 16 rows per step.
    # Per-step VMEM footprint is tiny (~0.4 MB weights + a few hundred KB of
    # activation tiles), far below the default scoped-VMEM limits on all
    # generations; only if tb were pushed past ~2048 on v5e would an explicit
    # pltpu.CompilerParams(vmem_limit_bytes=...) be needed.
    TARGET_TB = 1024
    if block_rows is None:
        nb = max(4, _cdiv(B, TARGET_TB))
    else:
        nb = max(4, _cdiv(B, max(16, _round_up(block_rows, 16))))
    if nb % 2:
        nb += 1
    tb = max(16, _round_up(_cdiv(B, nb), 16))
    B_pad = nb * tb
    if B_pad != B:
        attr_t = jnp.pad(attr_t, ((0, B_pad - B), (0, 0)))
        sptm_t = jnp.pad(sptm_t, ((0, B_pad - B), (0, 0)))

    kernel = make_entire_estimator_kernel(L)

    in_specs = [
        # Activation tiles (bf16). If profiling ever shows exposed input DMA,
        # add pipeline_mode=pl.Buffered(3) to these two specs (weights below
        # are resident via the constant index_map and never re-DMA'd).
        pl.BlockSpec((tb, A), lambda i: (i, 0)),
        pl.BlockSpec((tb, S), lambda i: (i, 0)),
        # Weights / biases: VMEM-resident across the whole grid.
        pl.BlockSpec((A, H), lambda i: (0, 0)),
        pl.BlockSpec((S, H), lambda i: (0, 0)),
        pl.BlockSpec((1, H), lambda i: (0, 0)),
        pl.BlockSpec((L, H, H), lambda i: (0, 0, 0)),
        pl.BlockSpec((L, 1, H), lambda i: (0, 0, 0)),
        pl.BlockSpec((1, H), lambda i: (0, 0)),
        pl.BlockSpec((1, 1), lambda i: (0, 0)),
    ]
    out_specs = pl.BlockSpec((1, 1, tb), lambda i: (i, 0, 0))

    # Updated scheduler hint: no 128-wide padded output matmul / store anymore.
    flops = 2 * B_pad * ((A + S) * H + L * H * H + H)
    bytes_accessed = (
        2 * B_pad * (A + S)                       # bf16 activation reads
        + 2 * ((A + S) * H + L * H * H)           # bf16 weight reads
        + 4 * (H + L * H + H + 1)                 # f32 biases + hid2out vector
        + 4 * B_pad)                              # f32 scalar-per-row output

    out3 = pl.pallas_call(
        kernel,
        out_shape=jax.ShapeDtypeStruct((nb, 1, tb), jnp.float32),
        grid_spec=pltpu.PrefetchScalarGridSpec(
            num_scalar_prefetch=0,
            grid=(nb,),
            in_specs=in_specs,
            out_specs=out_specs,
        ),
        compiler_params=pltpu.CompilerParams(
            dimension_semantics=("parallel",)),
        cost_estimate=pl.CostEstimate(
            flops=flops, transcendentals=0, bytes_accessed=bytes_accessed),
    )(attr_t, sptm_t, w_in_a, w_in_s, b_in2, w_res_b, b_res3,
      w_out_row, b_out_11)

    # (nb, 1, tb) -> flat row order -> (B, 1)
    return out3.reshape(B_pad, 1)[:B]


def entire_estimator_reference(attr_t, sptm_t, params):
    """Pure-JAX f32 reference mirroring the PyTorch forward (the spec)."""
    x = jnp.concatenate([attr_t.astype(jnp.float32),
                         sptm_t.astype(jnp.float32)], axis=1)
    h = jax.nn.leaky_relu(x @ params["w_in"] + params["b_in"], NEG_SLOPE)
    for i in range(params["w_res"].shape[0]):
        r = jax.nn.leaky_relu(h @ params["w_res"][i] + params["b_res"][i],
                              NEG_SLOPE)
        h = h + r
    return h @ params["w_out"] + params["b_out"]


def entire_estimator_reference_bf16(attr_t, sptm_t, params):
    """Reference with the kernel's exact operand rounding (bf16 MXU operands,
    f32 accumulation) — used for a tight numerical check."""
    f32, bf16 = jnp.float32, jnp.bfloat16
    a = attr_t.astype(bf16)
    s = sptm_t.astype(bf16)
    ad = a.shape[1]
    w_in = params["w_in"].astype(bf16)
    h = (jnp.dot(a, w_in[:ad], preferred_element_type=f32)
         + jnp.dot(s, w_in[ad:], preferred_element_type=f32))
    h = jax.nn.leaky_relu(h + params["b_in"].astype(f32), NEG_SLOPE)
    for i in range(params["w_res"].shape[0]):
        r = jnp.dot(h.astype(bf16), params["w_res"][i].astype(bf16),
                    preferred_element_type=f32) + params["b_res"][i]
        h = h + jax.nn.leaky_relu(r, NEG_SLOPE)
    return h @ params["w_out"] + params["b_out"]


# TODO(synk): eval_on_batch (de-normalization + masked MAPE loss) is a
# training/eval utility, not part of the forward pass; not implemented here.


if __name__ == "__main__":
    # Small shapes consistent with DeepTTE: attr vector (4+8+16+1)=29,
    # spatio-temporal hidden 128, hidden_size=128, num_final_fcs=3.
    B, attr_dim, sptm_dim, H, L = 8, 29, 128, 128, 3

    key = jax.random.PRNGKey(0)
    k = jax.random.split(key, 8)
    params = {
        "w_in": jax.random.normal(k[0], (attr_dim + sptm_dim, H),
                                  jnp.float32) * 0.05,
        "b_in": jax.random.normal(k[1], (H,), jnp.float32) * 0.05,
        "w_res": jax.random.normal(k[2], (L, H, H), jnp.float32) * 0.05,
        "b_res": jax.random.normal(k[3], (L, H), jnp.float32) * 0.05,
        "w_out": jax.random.normal(k[4], (H, 1), jnp.float32) * 0.05,
        "b_out": jax.random.normal(k[5], (1,), jnp.float32) * 0.05,
    }
    attr_t = jax.random.normal(k[6], (B, attr_dim), jnp.float32)
    sptm_t = jax.random.normal(k[7], (B, sptm_dim), jnp.float32)

    out = entire_estimator_forward(attr_t, sptm_t, params)
    out = jax.block_until_ready(out)
    assert out.shape == (B, 1)

    # Tight check vs a reference with identical bf16 operand rounding.
    ref_q = entire_estimator_reference_bf16(attr_t, sptm_t, params)
    err_q = float(jnp.max(jnp.abs(out - ref_q)))
    assert jnp.allclose(out, ref_q, atol=2e-3, rtol=2e-3), err_q

    # Loose sanity check vs the f32 spec (bf16-MXU accuracy tradeoff signed
    # off in the performance review).
    ref = entire_estimator_reference(attr_t, sptm_t, params)
    err = float(jnp.max(jnp.abs(out - ref)))
    assert jnp.allclose(out, ref, atol=5e-2, rtol=5e-2), err

    print("KERNEL_OK")
</pallas_src>

<mosaic_0001>
module attributes {stable_mosaic.version = 11 : i64} {
  func.func @kernel(%arg0: i32, %arg1: memref<16x32xbf16, #tpu.memory_space<vmem>>, %arg2: memref<16x128xbf16, #tpu.memory_space<vmem>>, %arg3: memref<32x128xbf16, #tpu.memory_space<vmem>>, %arg4: memref<128x128xbf16, #tpu.memory_space<vmem>>, %arg5: memref<1x128xf32, #tpu.memory_space<vmem>>, %arg6: memref<3x128x128xbf16, #tpu.memory_space<vmem>>, %arg7: memref<3x1x128xf32, #tpu.memory_space<vmem>>, %arg8: memref<1x128xf32, #tpu.memory_space<vmem>>, %arg9: memref<1x1xf32, #tpu.memory_space<vmem>>, %arg10: memref<1x1x16xf32, #tpu.memory_space<vmem>>) attributes {dimension_semantics = [#tpu.dimension_semantics<parallel>], iteration_bounds = array<i64: 4>, scalar_prefetch = 0 : i64, scratch_operands = 0 : i64, tpu.core_type = #tpu.core_type<tc>, window_params = [{transform_indices = @transform_0, window_bounds = array<i64: 16, 32>}, {transform_indices = @transform_1, window_bounds = array<i64: 16, 128>}, {pipeline_mode = #tpu.pipeline_mode<synchronous>, transform_indices = @transform_2, window_bounds = array<i64: 32, 128>}, {pipeline_mode = #tpu.pipeline_mode<synchronous>, transform_indices = @transform_3, window_bounds = array<i64: 128, 128>}, {pipeline_mode = #tpu.pipeline_mode<synchronous>, transform_indices = @transform_4, window_bounds = array<i64: 1, 128>}, {pipeline_mode = #tpu.pipeline_mode<synchronous>, transform_indices = @transform_5, window_bounds = array<i64: 3, 128, 128>}, {pipeline_mode = #tpu.pipeline_mode<synchronous>, transform_indices = @transform_6, window_bounds = array<i64: 3, 1, 128>}, {pipeline_mode = #tpu.pipeline_mode<synchronous>, transform_indices = @transform_7, window_bounds = array<i64: 1, 128>}, {pipeline_mode = #tpu.pipeline_mode<synchronous>, transform_indices = @transform_8, window_bounds = array<i64: 1, 1>}, {transform_indices = @transform_9, window_bounds = array<i64: 1, 1, 16>}]} {
    %c0 = arith.constant 0 : index
    %c0_0 = arith.constant 0 : index
    %0 = vector.load %arg1[%c0, %c0_0] : memref<16x32xbf16, #tpu.memory_space<vmem>>, vector<16x32xbf16>
    %c0_1 = arith.constant 0 : index
    %c0_2 = arith.constant 0 : index
    %1 = vector.load %arg3[%c0_1, %c0_2] : memref<32x128xbf16, #tpu.memory_space<vmem>>, vector<32x128xbf16>
    %cst = arith.constant dense<0.000000e+00> : vector<16x128xf32>
    %2 = tpu.matmul %0, %1, %cst {dimension_numbers = #tpu.dot_dimension_numbers<[1], [0], [0], [1], [0, 0, 1, 1], [], []>} : vector<16x32xbf16>, vector<32x128xbf16>, vector<16x128xf32> -> vector<16x128xf32>
    %c0_3 = arith.constant 0 : index
    %c0_4 = arith.constant 0 : index
    %3 = vector.load %arg2[%c0_3, %c0_4] : memref<16x128xbf16, #tpu.memory_space<vmem>>, vector<16x128xbf16>
    %c0_5 = arith.constant 0 : index
    %c0_6 = arith.constant 0 : index
    %4 = vector.load %arg4[%c0_5, %c0_6] : memref<128x128xbf16, #tpu.memory_space<vmem>>, vector<128x128xbf16>
    %cst_7 = arith.constant dense<0.000000e+00> : vector<16x128xf32>
    %5 = tpu.matmul %3, %4, %cst_7 {dimension_numbers = #tpu.dot_dimension_numbers<[1], [0], [0], [1], [0, 0, 1, 1], [], []>} : vector<16x128xbf16>, vector<128x128xbf16>, vector<16x128xf32> -> vector<16x128xf32>
    %6 = arith.addf %2, %5 : vector<16x128xf32>
    %c0_8 = arith.constant 0 : index
    %c0_9 = arith.constant 0 : index
    %7 = vector.load %arg5[%c0_8, %c0_9] : memref<1x128xf32, #tpu.memory_space<vmem>>, vector<1x128xf32>
    %8 = vector.broadcast %7 : vector<1x128xf32> to vector<16x128xf32>
    %9 = arith.addf %6, %8 : vector<16x128xf32>
    %cst_10 = arith.constant 0.00999999977 : f32
    %10 = vector.broadcast %cst_10 : f32 to vector<16x128xf32>
    %11 = arith.mulf %10, %9 : vector<16x128xf32>
    %12 = arith.maximumf %9, %11 : vector<16x128xf32>
    %13 = arith.truncf %12 : vector<16x128xf32> to vector<16x128xbf16>
    %c0_11 = arith.constant 0 : index
    %c0_12 = arith.constant 0 : index
    %c0_13 = arith.constant 0 : index
    %14 = vector.load %arg6[%c0_11, %c0_12, %c0_13] : memref<3x128x128xbf16, #tpu.memory_space<vmem>>, vector<1x128x128xbf16>
    %15 = vector.shape_cast %14 : vector<1x128x128xbf16> to vector<128x128xbf16>
    %cst_14 = arith.constant dense<0.000000e+00> : vector<16x128xf32>
    %16 = tpu.matmul %13, %15, %cst_14 {dimension_numbers = #tpu.dot_dimension_numbers<[1], [0], [0], [1], [0, 0, 1, 1], [], []>} : vector<16x128xbf16>, vector<128x128xbf16>, vector<16x128xf32> -> vector<16x128xf32>
    %c0_15 = arith.constant 0 : index
    %c0_16 = arith.constant 0 : index
    %c0_17 = arith.constant 0 : index
    %17 = vector.load %arg7[%c0_15, %c0_16, %c0_17] : memref<3x1x128xf32, #tpu.memory_space<vmem>>, vector<1x1x128xf32>
    %18 = vector.shape_cast %17 : vector<1x1x128xf32> to vector<1x128xf32>
    %19 = vector.broadcast %18 : vector<1x128xf32> to vector<16x128xf32>
    %20 = arith.addf %16, %19 : vector<16x128xf32>
    %cst_18 = arith.constant 0.00999999977 : f32
    %21 = vector.broadcast %cst_18 : f32 to vector<16x128xf32>
    %22 = arith.mulf %21, %20 : vector<16x128xf32>
    %23 = arith.maximumf %20, %22 : vector<16x128xf32>
    %24 = arith.addf %12, %23 : vector<16x128xf32>
    %25 = arith.truncf %24 : vector<16x128xf32> to vector<16x128xbf16>
    %c1 = arith.constant 1 : index
    %c0_19 = arith.constant 0 : index
    %c0_20 = arith.constant 0 : index
    %26 = vector.load %arg6[%c1, %c0_19, %c0_20] : memref<3x128x128xbf16, #tpu.memory_space<vmem>>, vector<1x128x128xbf16>
    %27 = vector.shape_cast %26 : vector<1x128x128xbf16> to vector<128x128xbf16>
    %cst_21 = arith.constant dense<0.000000e+00> : vector<16x128xf32>
    %28 = tpu.matmul %25, %27, %cst_21 {dimension_numbers = #tpu.dot_dimension_numbers<[1], [0], [0], [1], [0, 0, 1, 1], [], []>} : vector<16x128xbf16>, vector<128x128xbf16>, vector<16x128xf32> -> vector<16x128xf32>
    %c1_22 = arith.constant 1 : index
    %c0_23 = arith.constant 0 : index
    %c0_24 = arith.constant 0 : index
    %29 = vector.load %arg7[%c1_22, %c0_23, %c0_24] : memref<3x1x128xf32, #tpu.memory_space<vmem>>, vector<1x1x128xf32>
    %30 = vector.shape_cast %29 : vector<1x1x128xf32> to vector<1x128xf32>
    %31 = vector.broadcast %30 : vector<1x128xf32> to vector<16x128xf32>
    %32 = arith.addf %28, %31 : vector<16x128xf32>
    %cst_25 = arith.constant 0.00999999977 : f32
    %33 = vector.broadcast %cst_25 : f32 to vector<16x128xf32>
    %34 = arith.mulf %33, %32 : vector<16x128xf32>
    %35 = arith.maximumf %32, %34 : vector<16x128xf32>
    %36 = arith.addf %24, %35 : vector<16x128xf32>
    %37 = arith.truncf %36 : vector<16x128xf32> to vector<16x128xbf16>
    %c2 = arith.constant 2 : index
    %c0_26 = arith.constant 0 : index
    %c0_27 = arith.constant 0 : index
    %38 = vector.load %arg6[%c2, %c0_26, %c0_27] : memref<3x128x128xbf16, #tpu.memory_space<vmem>>, vector<1x128x128xbf16>
    %39 = vector.shape_cast %38 : vector<1x128x128xbf16> to vector<128x128xbf16>
    %cst_28 = arith.constant dense<0.000000e+00> : vector<16x128xf32>
    %40 = tpu.matmul %37, %39, %cst_28 {dimension_numbers = #tpu.dot_dimension_numbers<[1], [0], [0], [1], [0, 0, 1, 1], [], []>} : vector<16x128xbf16>, vector<128x128xbf16>, vector<16x128xf32> -> vector<16x128xf32>
    %c2_29 = arith.constant 2 : index
    %c0_30 = arith.constant 0 : index
    %c0_31 = arith.constant 0 : index
    %41 = vector.load %arg7[%c2_29, %c0_30, %c0_31] : memref<3x1x128xf32, #tpu.memory_space<vmem>>, vector<1x1x128xf32>
    %42 = vector.shape_cast %41 : vector<1x1x128xf32> to vector<1x128xf32>
    %43 = vector.broadcast %42 : vector<1x128xf32> to vector<16x128xf32>
    %44 = arith.addf %40, %43 : vector<16x128xf32>
    %cst_32 = arith.constant 0.00999999977 : f32
    %45 = vector.broadcast %cst_32 : f32 to vector<16x128xf32>
    %46 = arith.mulf %45, %44 : vector<16x128xf32>
    %47 = arith.maximumf %44, %46 : vector<16x128xf32>
    %48 = arith.addf %36, %47 : vector<16x128xf32>
    %c0_33 = arith.constant 0 : index
    %c0_34 = arith.constant 0 : index
    %49 = vector.load %arg8[%c0_33, %c0_34] : memref<1x128xf32, #tpu.memory_space<vmem>>, vector<1x128xf32>
    %50 = vector.broadcast %49 : vector<1x128xf32> to vector<16x128xf32>
    %51 = arith.mulf %48, %50 : vector<16x128xf32>
    %52 = tpu.transpose %51, [1, 0] : vector<16x128xf32> -> vector<128x16xf32>
    %cst_35 = arith.constant dense<0.000000e+00> : vector<16xf32>
    %53 = vector.multi_reduction <add>, %52, %cst_35 [0] : vector<128x16xf32> to vector<16xf32>
    %54 = vector.shape_cast %53 : vector<16xf32> to vector<1x16xf32>
    %c0_36 = arith.constant 0 : index
    %c0_37 = arith.constant 0 : index
    %55 = vector.load %arg9[%c0_36, %c0_37] : memref<1x1xf32, #tpu.memory_space<vmem>>, vector<1x1xf32>
    %56 = vector.broadcast %55 : vector<1x1xf32> to vector<1x16xf32>
    %57 = arith.addf %54, %56 : vector<1x16xf32>
    %58 = vector.shape_cast %57 : vector<1x16xf32> to vector<1x1x16xf32>
    %c0_38 = arith.constant 0 : index
    %c0_39 = arith.constant 0 : index
    %c0_40 = arith.constant 0 : index
    %59 = vector.load %arg10[%c0_38, %c0_39, %c0_40] : memref<1x1x16xf32, #tpu.memory_space<vmem>>, vector<1x1x16xf32>
    tpu.vector_store %arg10[%c0_38, %c0_39, %c0_40], %58 {strides = array<i32>} : memref<1x1x16xf32, #tpu.memory_space<vmem>>, vector<1x1x16xf32>,
    return
  }
  func.func @transform_0(%arg0: i32) -> (i32, i32) {
    %c0_i32 = arith.constant 0 : i32
    %c0_i32_0 = arith.constant 0 : i32
    return %arg0, %c0_i32 : i32, i32
  }
  func.func @transform_1(%arg0: i32) -> (i32, i32) {
    %c0_i32 = arith.constant 0 : i32
    %c0_i32_0 = arith.constant 0 : i32
    return %arg0, %c0_i32 : i32, i32
  }
  func.func @transform_2(%arg0: i32) -> (i32, i32) {
    %c0_i32 = arith.constant 0 : i32
    %c0_i32_0 = arith.constant 0 : i32
    %c0_i32_1 = arith.constant 0 : i32
    return %c0_i32, %c0_i32_0 : i32, i32
  }
  func.func @transform_3(%arg0: i32) -> (i32, i32) {
    %c0_i32 = arith.constant 0 : i32
    %c0_i32_0 = arith.constant 0 : i32
    %c0_i32_1 = arith.constant 0 : i32
    return %c0_i32, %c0_i32_0 : i32, i32
  }
  func.func @transform_4(%arg0: i32) -> (i32, i32) {
    %c0_i32 = arith.constant 0 : i32
    %c0_i32_0 = arith.constant 0 : i32
    %c0_i32_1 = arith.constant 0 : i32
    return %c0_i32, %c0_i32_0 : i32, i32
  }
  func.func @transform_5(%arg0: i32) -> (i32, i32, i32) {
    %c0_i32 = arith.constant 0 : i32
    %c0_i32_0 = arith.constant 0 : i32
    %c0_i32_1 = arith.constant 0 : i32
    %c0_i32_2 = arith.constant 0 : i32
    return %c0_i32, %c0_i32_0, %c0_i32_1 : i32, i32, i32
  }
  func.func @transform_6(%arg0: i32) -> (i32, i32, i32) {
    %c0_i32 = arith.constant 0 : i32
    %c0_i32_0 = arith.constant 0 : i32
    %c0_i32_1 = arith.constant 0 : i32
    %c0_i32_2 = arith.constant 0 : i32
    return %c0_i32, %c0_i32_0, %c0_i32_1 : i32, i32, i32
  }
  func.func @transform_7(%arg0: i32) -> (i32, i32) {
    %c0_i32 = arith.constant 0 : i32
    %c0_i32_0 = arith.constant 0 : i32
    %c0_i32_1 = arith.constant 0 : i32
    return %c0_i32, %c0_i32_0 : i32, i32
  }
  func.func @transform_8(%arg0: i32) -> (i32, i32) {
    %c0_i32 = arith.constant 0 : i32
    %c0_i32_0 = arith.constant 0 : i32
    %c0_i32_1 = arith.constant 0 : i32
    return %c0_i32, %c0_i32_0 : i32, i32
  }
  func.func @transform_9(%arg0: i32) -> (i32, i32, i32) {
    %c0_i32 = arith.constant 0 : i32
    %c0_i32_0 = arith.constant 0 : i32
    %c0_i32_1 = arith.constant 0 : i32
    return %arg0, %c0_i32, %c0_i32_0 : i32, i32, i32
  }
}

</mosaic_0001>

<bundles_post_ra>
// kernel: tpu_custom_call.1
= control target key start
LH: loop header
LB: loop body
LE: loop exit
PB: predicated region body
PF: predicated region fallthrough
CT: control target
= control target key end

     0   :  { %s1872_s0 = inlined_call_operand.vmem [shape: bf16[64,32], index: 0, kind: input, shape index: {}]   ;;  %s1873_s1 = inlined_call_operand.vmem [shape: bf16[64,128], index: 1, kind: input, shape index: {}]   ;;  %s1874_s2 = inlined_call_operand.vmem [shape: bf16[32,128], index: 2, kind: input, shape index: {}]   ;;  %s1875_s3 = inlined_call_operand.hbm [shape: bf16[128,128], index: 3, kind: input, shape index: {}]   ;;  %s1876_s4 = inlined_call_operand.vmem [shape: f32[1,128], index: 4, kind: input, shape index: {}]   ;;  %s1877_s5 = inlined_call_operand.hbm [shape: bf16[3,128,128], index: 5, kind: input, shape index: {}]   ;;  %s1878_s6 = inlined_call_operand.vmem [shape: f32[3,1,128], index: 6, kind: input, shape index: {}]   ;;  %s1879_s7 = inlined_call_operand.vmem [shape: f32[1,128], index: 7, kind: input, shape index: {}]   ;;  %s1880_s8 = inlined_call_operand.<no memory space> [shape: f32[1,1], index: 8, kind: input, shape index: {}]   ;;  %s1881_s9 = inlined_call_operand.hbm [shape: f32[4,1,16], index: 9, kind: output, shape index: {}]  }
   0x1   :  { %v14_v0 = vstv %s1880_s8 }
   0x2   :  { %15 = vst [vmem:[#allocation2] sm:$0x1] %v14_v0 }
   0x3   :  { %16 = vsyncpa [#allocation4], 0 }
   0x4   :  { %17 = vsyncpa [#allocation7], 0 }
   0x5   :  { %18 = vsyncpa [#allocation5], 0 }
   0x6   :  { %20 = vsyncpa [#allocation5 + $0x1], 0  ;;  %s1614_s11 = smov 0   ;;  %s1616_s12 = smov 0  }
   0x7   :  { %s1618_s13 = smov 0   ;;  %s1620_s14 = smov 0  }
   0x8 LB: > { %1886 = sst [smem:[#allocation12_spill]] %s1547_s13  ;;  %s1635_s8 = sadd.s32 4294967295, %s1551_s14   ;;  %s1551_s14 = sphi %s1620_s14, %s1903_s14   ;;  %s1547_s13 = sphi %s1618_s13, %s1900_s13   ;;  %s1543_s12 = sphi %s1616_s12, %s1902_s12   ;;  %s1539_s11 = sphi %s1614_s11, %s1901_s11  }
   0x9   : > { %s1136_s15 = sadd.s32 4294967294, %s1551_s14   ;;  %s1639_s16 = sadd.s32 1, %s1551_s14  }
   0xa   : > { %s232_s17 = sadd.s32 1, %s1547_s13  ;;  %s229_s18 = ssub.s32 %s1551_s14, %s1639_s16 }
   0xb   : > { %p242_p0 = scmp.ne.s32.totalorder %s1547_s13, %s1543_s12  ;;  %p230_p1 = scmp.eq.s32.totalorder %s229_s18, 0 }
   0xc   : > { %p243_p2 = scmp.eq.s32.totalorder %s1635_s8, 3  ;;  %p248_p3 = scmp.ne.s32.totalorder %s1543_s12, %s1539_s11 }
   0xd   : > { %p249_p4 = scmp.eq.s32.totalorder %s1136_s15, 3  ;;  %p1137_p7 = scmp.ge.s32.totalorder %s1551_s14, 1 }
   0xe   : > { %s1650_s19 = scalar_select %p230_p1, %s1547_s13, %s232_s17  }
   0xf   : > { %p1652_p5 = por %p243_p2, %p242_p0  ;;  %p1656_p6 = por %p249_p4, %p248_p3 }
  0x10   : > { %1887 = sst [smem:[#allocation13_spill]] %s1650_s19  ;;  %p256_p8 = scmp.lt.s32.totalorder %s1551_s14, 5 }
  0x11   : > { %s1888_s20 = scalar_select %p1652_p5, 1, 0 }
  0x12   : > { %s1889_s21 = scalar_select %p1656_p6, 1, 0 }
  0x13   : > { %p1882_p9 = scmp.eq.s32.totalorder %s1635_s8, 0  ;;  %p1663_p10 = pnand %p1137_p7, %p256_p8 }
  0x14   : > { %s1553_s23 = smov [#allocation3]   ;;  %s1554_s26 = smov [#allocation6]  }
  0x15   : > { %s1890_s22 = scalar_select %p1663_p10, 1, 0 }
  0x16   : > { %s271_s24 = sshll.u32 %s1553_s23, 4  ;;  %p1332_p11 = pneg %p1663_p10  ;;  %s272_s24 = int_to_ptr.vmem [resolvable:$true] %s271_s24 }
  0x17   : > { %s287_s27 = sshll.u32 %s1554_s26, 4  ;;  %s1425_s30 = scalar_lea.hbm %s1875_s3, 1024  ;;  %s1675_s27 = int_to_ptr.vmem [resolvable:$true] %s287_s27 }
  0x18   : > { %p1671_p12 = pnand %p1882_p9, %p1332_p11  ;;  %p1426_p13 = scmp.ne.s32.totalorder %s1875_s3, %s1425_s30 }
  0x19   : > { %p1432_p3 = scmp.lt.u32.totalorder %s1425_s30, %s1875_s3 }
  0x1a   : > { %p1427_p0 = pneg %p1671_p12 }
  0x1c   : > { %p1428_p1 = pnand %p1427_p0, %p1426_p13 }
  0x1e   : > { %p1429_p2 = pneg %p1428_p1 }
  0x20   : > { %p1434_p4 = pnand %p1432_p3, %p1429_p2 }
  0x22   : > { %1437 = shalt.err (!%p1434_p4)
}
  0x23   : > { %s1438_s23 = scalar_lea.vmem %s272_s24, 1024  ;;  %p1446_p9 = scmp.lt.s32.totalorder %s272_s24, %s272_s24 }
  0x24   : > { %p1439_p7 = scmp.ne.s32.totalorder %s272_s24, %s1438_s23  ;;  %p1447_p6 = scmp.lt.s32.totalorder %s1438_s23, %s1438_s23 }
  0x26   : > { %p1441_p8 = pnand %p1439_p7, %p1427_p0  ;;  %p1448_p5 = por %p1447_p6, %p1446_p9 }
  0x28   : > { %p1442_p11 = pneg %p1441_p8 }
  0x2a   : > { %p1449_p10 = pnand %p1448_p5, %p1442_p11 }
  0x2c   : > { %1452 = shalt.err (!%p1449_p10)
}
  0x2d   : > { %s1555_s26 = smov 64   ;;  %s1556_s28 = smov 4  }
  0x2e   : > { %1335 = dma.hbm_to_vmem [thread:$0]  (!%p1671_p12), %s1875_s3, 1024, %s272_s24, [#allocation4], %s1555_s26, %s1555_s26, %s1556_s28  }
  0x2f   : > { %s1453_s17 = scalar_lea.hbm %s1877_s5, 3072 }
  0x30   : > { %p1454_p13 = scmp.ne.s32.totalorder %s1877_s5, %s1453_s17  ;;  %p1460_p9 = scmp.lt.u32.totalorder %s1453_s17, %s1877_s5 }
  0x32   : > { %p1456_p5 = pnand %p1454_p13, %p1427_p0 }
  0x34   : > { %p1457_p6 = pneg %p1456_p5 }
  0x36   : > { %p1462_p10 = pnand %p1460_p9, %p1457_p6 }
  0x38   : > { %1465 = shalt.err (!%p1462_p10)
}
  0x39   : > { %s1466_s24 = scalar_lea.vmem %s1675_s27, 3072  ;;  %p1474_p4 = scmp.lt.s32.totalorder %s1675_s27, %s1675_s27 }
  0x3a   : > { %p1467_p1 = scmp.ne.s32.totalorder %s1675_s27, %s1466_s24  ;;  %p1475_p7 = scmp.lt.s32.totalorder %s1466_s24, %s1466_s24 }
  0x3c   : > { %p1469_p2 = pnand %p1467_p1, %p1427_p0  ;;  %p1476_p8 = por %p1475_p7, %p1474_p4 }
  0x3e   : > { %p1470_p3 = pneg %p1469_p2 }
  0x40   : > { %p1477_p11 = pnand %p1476_p8, %p1470_p3 }
  0x42   : > { %1480 = shalt.err (!%p1477_p11)
}
  0x43   : > { %1338 = dma.hbm_to_vmem [thread:$0]  (!%p1671_p12), %s1877_s5, 3072, %s1675_s27, [#allocation7], %s1555_s26, %s1555_s26, %s1556_s28  }
  0x44   : > { %p1892_p13 = scmp.ne.s32.totalorder %s1890_s22, 0 }
  0x45   : > { %p1893_p5 = scmp.eq.s32.totalorder (!%p1892_p13), %s1635_s8, 0 }
  0x46   : > { %330 = sbr.rel (%p1892_p13) target bundleno = 1230 (0x4ce), region = 56 }
  0x4d   : > { %1526 = dma.done.wait (%p1893_p5), [#allocation4], 1024   ;;  %p1894_p0 = pmov %p1893_p5 }
  0x4f   : > { %1528 = vsyncadd (%p1894_p0), [#allocation4], 4294966272  ;;  %p1895_p6 = pmov %p1894_p0 }
  0x50   : > { %p1896_p9 = pmov %p1894_p0 }
  0x51   : > { %1530 = dma.done.wait (%p1895_p6), [#allocation7], 3072  }
  0x52   : > { %1532 = vsyncadd (%p1896_p9), [#allocation7], 4294964224  ;;  %v1557_v1 = vmov 0.0   ;;  %s1144_s22 = sshll.u32 %s1635_s8, 1  ;;  %vm1558_vm0 = vmmov 0   ;;  %v1389_v2 = vld [vmem:[#allocation3] sm:$0xff]  }
  0x53   : > { %1234 = vmatprep.subr.bf16.mxu0 %v1557_v1  ;;  %1254 = vmatprep.subr.bf16.mxu1 %v1557_v1  ;;  %p375_p12 = scmp.lt.s32.totalorder %s1144_s22, 7  ;;  %v1390_v3 = vld [vmem:[#allocation3 + $0x8] sm:$0xff]   ;;  %v1391_v4 = vld [vmem:[#allocation3 + $0x10] sm:$0xff]   ;;  %v1395_v5 = vld [vmem:[%s1874_s2] sm:$0xff]   ;;  %vm523_vm1 = vcmask 261120   ;;  %vm983_vm2 = vcmask 130048  }
  0x54   : > { %1258 = vmatprep.mubr.msk.bf16.mxu1 %vm1558_vm0, %v1557_v1  ;;  %1250 = vmatprep.mubr.msk.bf16.mxu0 %vm1558_vm0, %v1557_v1  ;;  %v1397_v6 = vld [vmem:[%s1874_s2 + $0x8] sm:$0xff]   ;;  %v1392_v7 = vld [vmem:[#allocation3 + $0x18] sm:$0xff]   ;;  %v1403_v13 = vld [vmem:[#allocation6 + $0x10] sm:$0xff]   ;;  %s372_s10 = sand.u32 1, %s1543_s12   ;;  %vm1032_vm3 = vcmask 122880   ;;  %p1897_p1 = scmp.ne.s32.totalorder %s1888_s20, 0 }
  0x55   : > { %s1905_s22 = smov (!%p375_p12, %s1144_s22), 7  ;;  %1235 = vmatpush3.bf16.msra.mxu0 %v1389_v2  ;;  %1255 = vmatpush3.bf16.msra.mxu1 %v1395_v5  ;;  %v1401_v9 = vld [vmem:[#allocation6] sm:$0xff]   ;;  %v1402_v11 = vld [vmem:[#allocation6 + $0x8] sm:$0xff]   ;;  %v1396_v14 = vld [vmem:[#allocation3 + $0x30] sm:$0xff]   ;;  %s373_s17 = scalar_lea.vmem [#allocation8], %s372_s10 }
  0x56   : > { %1236 = vmatprep.subr.bf16.mxu0 %v1557_v1  ;;  %s1145_s25 = sshll.u32 %s1905_s22, 2  ;;  %1256 = vmatprep.subr.bf16.mxu1 %v1557_v1  ;;  %v1393_v10 = vld [vmem:[#allocation3 + $0x20] sm:$0xff]   ;;  %v1394_v12 = vld [vmem:[#allocation3 + $0x28] sm:$0xff]   ;;  %v1404_v15 = vld [vmem:[#allocation6 + $0x18] sm:$0xff]   ;;  %s1047_s18 = sshll.u32 %s373_s17, 4  ;;  %s1832_s18 = int_to_ptr.vmem [resolvable:$true] %s1047_s18 }
  0x57   : > { %s378_s15 = scalar_lea.vmem %s1872_s0, %s1145_s25  ;;  %s1756_s23 = scalar_lea.vmem %s1873_s1, %s1145_s25  ;;  %v1398_v16 = vld [vmem:[#allocation3 + $0x38] sm:$0xff]   ;;  %v1405_v18 = vld [vmem:[#allocation6 + $0x20] sm:$0xff]   ;;  %v1406_v19 = vld [vmem:[#allocation6 + $0x28] sm:$0xff]  }
  0x58   : > { %v1399_v8 = vld [vmem:[%s378_s15] sm:$0xff]   ;;  %v1407_v20 = vld [vmem:[#allocation6 + $0x30] sm:$0xff]   ;;  %v1410_v23 = vld [vmem:[#allocation6 + $0x48] sm:$0xff]   ;;  %s1192_s15 = sshll.u32 %s1635_s8, 4  ;;  %s1035_s19 = scalar_lea.sflag [#allocation5], %s372_s10 }
  0x59   : > { %1237 = vmatpush3.bf16.msra.mxu0 %v1390_v3  ;;  %1257 = vmatpush3.bf16.msra.mxu1 %v1397_v6  ;;  %v1400_v17 = vld [vmem:[%s1756_s23] sm:$0xff]   ;;  %v1411_v24 = vld [vmem:[#allocation6 + $0x50] sm:$0xff]   ;;  %v1414_v45 = vld [vmem:[#allocation6 + $0x68] sm:$0xff]   ;;  %s1830_s13 = scalar_lea.hbm %s1881_s9, %s1192_s15  ;;  %s1481_s22 = scalar_lea.vmem %s1832_s18, 16 }
  0x5a   : > { %1238 = vmatprep.subr.bf16.mxu0 %v1557_v1  ;;  %1262 = vmatprep.subr.bf16.mxu1 %v1557_v1  ;;  %v1408_v21 = vld [vmem:[#allocation6 + $0x38] sm:$0xff]   ;;  %v1409_v22 = vld [vmem:[#allocation6 + $0x40] sm:$0xff]   ;;  %v1415_v46 = vld [vmem:[#allocation6 + $0x70] sm:$0xff]   ;;  %p1482_p10 = scmp.ne.s32.totalorder %s1832_s18, %s1481_s22  ;;  %s1560_s8 = smov [#allocation8]  }
  0x5b   : > { %v1412_v25 = vld [vmem:[#allocation6 + $0x58] sm:$0xff]   ;;  %v1413_v26 = vld [vmem:[#allocation6 + $0x60] sm:$0xff]   ;;  %v1418_v49 = vld [vmem:[#allocation6 + $0x88] sm:$0xff]   ;;  %s1485_s25 = sshll.u32 %s1560_s8, 4  ;;  %s1486_s25 = int_to_ptr.vmem [resolvable:$false] %s1485_s25 }
  0x5c   : > { %1259 = vmatmul.mubr.msk.bf16.vlgmr.msra.gmra.mrb[0].mxu1 %vm523_vm1, %v1399_v8  ;;  %v1161_v32 = vld [vmem:[%s1876_s4] ss:$0 sm:$0xff]  ;;  %v1417_v48 = vld [vmem:[#allocation6 + $0x80] sm:$0xff]   ;;  %v1419_v50 = vld [vmem:[#allocation6 + $0x90] sm:$0xff]   ;;  %p1483_p2 = pnand %p1482_p10, %p1897_p1  ;;  %s1487_s27 = scalar_lea.vmem %s1486_s25, 32 }
  0x5d   : > { %1239 = vmatpush3.bf16.msra.mxu0 %v1391_v4  ;;  %1263 = vmatpush3.bf16.msra.mxu1 %v1401_v9  ;;  %v1416_v47 = vld [vmem:[#allocation6 + $0x78] sm:$0xff]   ;;  %v1421_v52 = vld [vmem:[#allocation6 + $0xa0] sm:$0xff]   ;;  %v1422_v4 = vld [vmem:[#allocation6 + $0xa8] sm:$0xff]   ;;  %p1488_p4 = scmp.lt.s32.totalorder %s1832_s18, %s1486_s25  ;;  %p1489_p7 = scmp.lt.s32.totalorder %s1487_s27, %s1481_s22 }
  0x5e   : > { %1240 = vmatprep.subr.bf16.mxu0 %v1557_v1  ;;  %1278 = vmatprep.mubr.msk.bf16.mxu1 %vm1558_vm0, %v1557_v1  ;;  %v1420_v51 = vld [vmem:[#allocation6 + $0x98] sm:$0xff]   ;;  %v1423_v5 = vld [vmem:[#allocation6 + $0xb0] sm:$0xff]   ;;  %p1484_p3 = pneg %p1483_p2 }
  0x5f   : > { %1264 = vmatprep.subr.bf16.mxu1 %v1557_v1  ;;  %v1162_v53 = vld [vmem:[%s1878_s6] ss:$0 sm:$0xff]  ;;  %p1490_p8 = por %p1489_p7, %p1488_p4 }
  0x60   : > { %v1424_v6 = vld [vmem:[#allocation6 + $0xb8] sm:$0xff]  }
  0x61   : > { %1241 = vmatpush3.bf16.msra.mxu0 %v1392_v7  ;;  %1265 = vmatpush3.bf16.msra.mxu1 %v1402_v11  ;;  %v1172_v7 = vld [vmem:[%s1878_s6 + $0x1] ss:$0 sm:$0xff]  ;;  %p1491_p11 = pnand %p1490_p8, %p1484_p3 }
  0x62   : > { %1242 = vmatprep.subr.bf16.mxu0 %v1557_v1  ;;  %1266 = vmatprep.subr.bf16.mxu1 %v1557_v1 }
  0x65   : > { %1243 = vmatpush3.bf16.msra.mxu0 %v1393_v10  ;;  %1267 = vmatpush3.bf16.msra.mxu1 %v1403_v13 }
  0x66   : > { %1244 = vmatprep.subr.bf16.mxu0 %v1557_v1  ;;  %1268 = vmatprep.subr.bf16.mxu1 %v1557_v1 }
  0x69   : > { %1245 = vmatpush3.bf16.msra.mxu0 %v1394_v12  ;;  %1269 = vmatpush3.bf16.msra.mxu1 %v1404_v15 }
  0x6a   : > { %1246 = vmatprep.subr.bf16.mxu0 %v1557_v1  ;;  %1270 = vmatprep.subr.bf16.mxu1 %v1557_v1 }
  0x6d   : > { %1247 = vmatpush3.bf16.msra.mxu0 %v1396_v14  ;;  %1271 = vmatpush3.bf16.msra.mxu1 %v1405_v18 }
  0x6e   : > { %1248 = vmatprep.subr.bf16.mxu0 %v1557_v1  ;;  %1272 = vmatprep.subr.bf16.mxu1 %v1557_v1 }
  0x71   : > { %1249 = vmatpush3.bf16.msra.mxu0 %v1398_v16  ;;  %1273 = vmatpush3.bf16.msra.mxu1 %v1406_v19 }
  0x72   : > { %1282 = vmatprep.subr.bf16.mxu0 %v1557_v1  ;;  %1274 = vmatprep.subr.bf16.mxu1 %v1557_v1 }
  0x74   : > { %1251 = vmatmul.mubr.bf16.vlgmr.msra.gmra.mrb[0].mxu0 %v1400_v17 }
  0x75   : > { %1298 = vmatprep.mubr.msk.bf16.mxu0 %vm1558_vm0, %v1557_v1  ;;  %1275 = vmatpush3.bf16.msra.mxu1 %v1407_v20 }
  0x76   : > { %1276 = vmatprep.subr.bf16.mxu1 %v1557_v1  ;;  %1283 = vmatpush3.bf16.msra.mxu0 %v1409_v22  ;;  %v1182_v22 = vld [vmem:[%s1878_s6 + $0x2] ss:$0 sm:$0xff] }
  0x77   : > { %1284 = vmatprep.subr.bf16.mxu0 %v1557_v1 }
  0x79   : > { %1277 = vmatpush3.bf16.msra.mxu1 %v1408_v21  ;;  %v1559_v21 = vmov 0  }
  0x7a   : > { %1302 = vmatprep.subr.bf16.mxu1 %v1557_v1  ;;  %1285 = vmatpush3.bf16.msra.mxu0 %v1410_v23 }
  0x7b   : > { %1286 = vmatprep.subr.bf16.mxu0 %v1557_v1  ;;  %1387 = vset.pattern.permute.xlu1 %v1559_v21 }
  0x7e   : > { %1287 = vmatpush3.bf16.msra.mxu0 %v1411_v24 }
  0x7f   : > { %1288 = vmatprep.subr.bf16.mxu0 %v1557_v1 }
  0x82   : > { %1289 = vmatpush3.bf16.msra.mxu0 %v1412_v25 }
  0x83   : > { %1290 = vmatprep.subr.bf16.mxu0 %v1557_v1 }
  0x86   : > { %1291 = vmatpush3.bf16.msra.mxu0 %v1413_v26 }
  0x87   : > { %1292 = vmatprep.subr.bf16.mxu0 %v1557_v1 }
  0x8a   : > { %1293 = vmatpush3.bf16.msra.mxu0 %v1414_v45 }
  0x8b   : > { %1294 = vmatprep.subr.bf16.mxu0 %v1557_v1 }
  0x8e   : > { %1295 = vmatpush3.bf16.msra.mxu0 %v1415_v46 }
  0x8f   : > { %1296 = vmatprep.subr.bf16.mxu0 %v1557_v1 }
  0x92   : > { %1297 = vmatpush3.bf16.msra.mxu0 %v1416_v47 }
 0x12f   : > { %v561_v27 = vpop.f32.mrb[0].mxu1 }
 0x130   : > { %v1260_v28 = vpop.f32.mrb[1].mxu1 }
 0x131   : > { %v564_v29 = vpop.f32.mrb[2].mxu1 }
 0x132   : > { %v1261_v30 = vpop.f32.mrb[3].mxu1 }
 0x147   : > { %v499_v31 = vpop.f32.mrb[0].mxu0 }
 0x148   : > { %v562_v33 = vadd.f32 %v561_v27, %v499_v31  ;;  %v1252_v34 = vpop.f32.mrb[1].mxu0 }
 0x149   : > { %v502_v35 = vpop.f32.mrb[2].mxu0 }
 0x14a   : > { %v575_v36 = vadd.f32 %v1161_v32, %v562_v33  ;;  %v565_v37 = vadd.f32 %v564_v29, %v502_v35  ;;  %v1253_v38 = vpop.f32.mrb[3].mxu0 }
 0x14c   : > { %v577_v39 = vmul.f32 0.01, %v575_v36  ;;  %v576_v40 = vadd.f32 %v1161_v32, %v565_v37  ;;  %v1191_v32 = vld [vmem:[%s1879_s7] ss:$0 sm:$0xff] }
 0x14e   : > { %v578_v41 = vmul.f32 0.01, %v576_v40  ;;  %v579_v42 = vmax.f32 %v575_v36, %v577_v39 }
 0x150   : > { %v580_v43 = vmax.f32 %v576_v40, %v578_v41 }
 0x152   : > { %v581_v44 = vpack.c.bf16 %v580_v43, %v579_v42 }
 0x154   : > { %1279 = vmatmul.mubr.bf16.vlgmr.msra.gmra.mrb[4].mxu1 %v581_v44 }
 0x155   : > { %1318 = vmatprep.mubr.msk.bf16.mxu1 %vm1558_vm0, %v1557_v1  ;;  %1303 = vmatpush3.bf16.msra.mxu1 %v1417_v48 }
 0x156   : > { %1304 = vmatprep.subr.bf16.mxu1 %v1557_v1 }
 0x159   : > { %1305 = vmatpush3.bf16.msra.mxu1 %v1418_v49 }
 0x15a   : > { %1306 = vmatprep.subr.bf16.mxu1 %v1557_v1 }
 0x15d   : > { %1307 = vmatpush3.bf16.msra.mxu1 %v1419_v50 }
 0x15e   : > { %1308 = vmatprep.subr.bf16.mxu1 %v1557_v1 }
 0x161   : > { %1309 = vmatpush3.bf16.msra.mxu1 %v1420_v51 }
 0x162   : > { %1310 = vmatprep.subr.bf16.mxu1 %v1557_v1 }
 0x165   : > { %1311 = vmatpush3.bf16.msra.mxu1 %v1421_v52 }
 0x166   : > { %1312 = vmatprep.subr.bf16.mxu1 %v1557_v1 }
 0x169   : > { %1313 = vmatpush3.bf16.msra.mxu1 %v1422_v4 }
 0x16a   : > { %1314 = vmatprep.subr.bf16.mxu1 %v1557_v1 }
 0x16d   : > { %1315 = vmatpush3.bf16.msra.mxu1 %v1423_v5 }
 0x16e   : > { %1316 = vmatprep.subr.bf16.mxu1 %v1557_v1  ;;  %v1021_v1 = vld [vmem:[#allocation2] sm:$0x1] }
 0x16f   : > { %1024 = vperm.xlu1 %1387, %v1021_v1  }
 0x171   : > { %1317 = vmatpush3.bf16.msra.mxu1 %v1424_v6 }
 0x227   : > { %v687_v54 = vpop.f32.mrb[4].mxu1 }
 0x228   : > { %v688_v55 = vadd.f32 %v1162_v53, %v687_v54  ;;  %v1280_v56 = vpop.f32.mrb[5].mxu1 }
 0x229   : > { %v690_v57 = vpop.f32.mrb[6].mxu1 }
 0x22a   : > { %v694_v58 = vmul.f32 0.01, %v688_v55  ;;  %v691_v59 = vadd.f32 %v1162_v53, %v690_v57  ;;  %v1281_v60 = vpop.f32.mrb[7].mxu1 }
 0x22c   : > { %v696_v61 = vmax.f32 %v688_v55, %v694_v58  ;;  %v695_v62 = vmul.f32 0.01, %v691_v59 }
 0x22e   : > { %v697_v63 = vmax.f32 %v691_v59, %v695_v62  ;;  %v698_v0 = vadd.f32 %v696_v61, %v579_v42 }
 0x230   : > { %v699_v2 = vadd.f32 %v697_v63, %v580_v43 }
 0x232   : > { %v700_v3 = vpack.c.bf16 %v699_v2, %v698_v0 }
 0x234   : > { %1299 = vmatmul.mubr.bf16.vlgmr.msra.gmra.mrb[4].mxu0 %v700_v3 }
 0x307   : > { %v808_v8 = vpop.f32.mrb[4].mxu0 }
 0x308   : > { %v809_v9 = vadd.f32 %v1172_v7, %v808_v8  ;;  %v1300_v10 = vpop.f32.mrb[5].mxu0 }
 0x309   : > { %v811_v11 = vpop.f32.mrb[6].mxu0 }
 0x30a   : > { %v815_v12 = vmul.f32 0.01, %v809_v9  ;;  %v812_v13 = vadd.f32 %v1172_v7, %v811_v11  ;;  %v1301_v14 = vpop.f32.mrb[7].mxu0 }
 0x30c   : > { %v817_v15 = vmax.f32 %v809_v9, %v815_v12  ;;  %v816_v16 = vmul.f32 0.01, %v812_v13 }
 0x30e   : > { %v818_v17 = vmax.f32 %v812_v13, %v816_v16  ;;  %v819_v18 = vadd.f32 %v817_v15, %v698_v0 }
 0x310   : > { %v820_v19 = vadd.f32 %v818_v17, %v699_v2 }
 0x312   : > { %v821_v20 = vpack.c.bf16 %v820_v19, %v819_v18 }
 0x314   : > { %1319 = vmatmul.mubr.bf16.vlgmr.msra.gmra.mrb[8].mxu1 %v821_v20  ;;  %v1027_v20 = vlaneseq }
 0x3e7   : > { %v929_v23 = vpop.f32.mrb[8].mxu1 }
 0x3e8   : > { %v930_v24 = vadd.f32 %v1182_v22, %v929_v23  ;;  %v1320_v25 = vpop.f32.mrb[9].mxu1  ;;  %v1028_v23 = vshrl.u32 %v1027_v20, 7 }
 0x3e9   : > { %v932_v26 = vpop.f32.mrb[10].mxu1 }
 0x3ea   : > { %v936_v27 = vmul.f32 0.01, %v930_v24  ;;  %v933_v28 = vadd.f32 %v1182_v22, %v932_v26  ;;  %v1321_v29 = vpop.f32.mrb[11].mxu1  ;;  %v1029_v26 = vsub.s32 0, %v1028_v23 }
 0x3ec   : > { %v938_v30 = vmax.f32 %v930_v24, %v936_v27  ;;  %v937_v31 = vmul.f32 0.01, %v933_v28  ;;  %v1025_v27 = vpop.permute.xlu1 %1024 }
 0x3ee   : > { %v939_v33 = vmax.f32 %v933_v28, %v937_v31  ;;  %v940_v34 = vadd.f32 %v938_v30, %v819_v18  ;;  %v1030_v30 = vrot.slane %v1025_v27, %v1029_v26 }
 0x3f0   : > { %v949_v35 = vmul.f32 %v1191_v32, %v940_v34  ;;  %v941_v36 = vadd.f32 %v939_v33, %v820_v19 }
 0x3f2   : > { %951 = vxpose.xlu0.b32.start [1/2] (short) %v949_v35, 128  ;;  %v950_v37 = vmul.f32 %v1191_v32, %v941_v36 }
 0x3f6   : > { %952 = vxpose.xlu0.b32.end [2/2] (short) %v950_v37, 128 }
 0x41f   : > { %1388 = vset.pattern.permute.xlu0 %v1559_v21 }
 0x472   : > { %v967_v38 = vpop.trf.xlu0 }
 0x473   : > { %v984_v48 = vsel %vm983_vm2, %v967_v38, 0.0 }
 0x476   : > { %v968_v39 = vpop.trf.xlu0 }
 0x477   : > { %v985_v46 = vsel %vm983_vm2, %v968_v39, 0.0 }
 0x478   : > { %v986_v50 = vadd.f32 %v985_v46, %v984_v48 }
 0x47a   : > { %v969_v40 = vpop.trf.xlu0 }
 0x47b   : > { %v987_v49 = vsel %vm983_vm2, %v969_v40, 0.0 }
 0x47c   : > { %v988_v52 = vadd.f32 %v987_v49, %v986_v50 }
 0x47e   : > { %v970_v41 = vpop.trf.xlu0 }
 0x47f   : > { %v989_v51 = vsel %vm983_vm2, %v970_v41, 0.0 }
 0x480   : > { %v990_v55 = vadd.f32 %v989_v51, %v988_v52 }
 0x482   : > { %v971_v42 = vpop.trf.xlu0 }
 0x483   : > { %v991_v54 = vsel %vm983_vm2, %v971_v42, 0.0 }
 0x484   : > { %v992_v57 = vadd.f32 %v991_v54, %v990_v55 }
 0x486   : > { %v972_v43 = vpop.trf.xlu0 }
 0x487   : > { %v993_v56 = vsel %vm983_vm2, %v972_v43, 0.0 }
 0x488   : > { %v994_v60 = vadd.f32 %v993_v56, %v992_v57 }
 0x48a   : > { %v973_v44 = vpop.trf.xlu0 }
 0x48b   : > { %v995_v59 = vsel %vm983_vm2, %v973_v44, 0.0 }
 0x48c   : > { %v996_v62 = vadd.f32 %v995_v59, %v994_v60 }
 0x48e   : > { %v974_v45 = vpop.trf.xlu0 }
 0x48f   : > { %v997_v61 = vsel %vm983_vm2, %v974_v45, 0.0 }
 0x490   : > { %v998_v2 = vadd.f32 %v997_v61, %v996_v62 }
 0x492   : > { %v975_v47 = vpop.trf.xlu0 }
 0x493   : > { %v999_v0 = vsel %vm983_vm2, %v975_v47, 0.0 }
 0x494   : > { %v1000_v4 = vadd.f32 %v999_v0, %v998_v2 }
 0x496   : > { %v976_v53 = vpop.trf.xlu0 }
 0x497   : > { %v1001_v3 = vsel %vm983_vm2, %v976_v53, 0.0 }
 0x498   : > { %v1002_v7 = vadd.f32 %v1001_v3, %v1000_v4 }
 0x49a   : > { %v977_v58 = vpop.trf.xlu0 }
 0x49b   : > { %v1003_v6 = vsel %vm983_vm2, %v977_v58, 0.0 }
 0x49c   : > { %v1004_v9 = vadd.f32 %v1003_v6, %v1002_v7 }
 0x49e   : > { %v978_v63 = vpop.trf.xlu0 }
 0x49f   : > { %v1005_v8 = vsel %vm983_vm2, %v978_v63, 0.0 }
 0x4a0   : > { %v1006_v12 = vadd.f32 %v1005_v8, %v1004_v9 }
 0x4a2   : > { %v979_v5 = vpop.trf.xlu0 }
 0x4a3   : > { %v1007_v11 = vsel %vm983_vm2, %v979_v5, 0.0 }
 0x4a4   : > { %v1008_v14 = vadd.f32 %v1007_v11, %v1006_v12 }
 0x4a6   : > { %v980_v10 = vpop.trf.xlu0 }
 0x4a7   : > { %v1009_v13 = vsel %vm983_vm2, %v980_v10, 0.0 }
 0x4a8   : > { %v1010_v17 = vadd.f32 %v1009_v13, %v1008_v14 }
 0x4aa   : > { %v981_v15 = vpop.trf.xlu0 }
 0x4ab   : > { %v1011_v16 = vsel %vm983_vm2, %v981_v15, 0.0 }
 0x4ac   : > { %v1012_v18 = vadd.f32 %v1011_v16, %v1010_v17 }
 0x4ae   : > { %v982_v19 = vpop.trf.xlu0 }
 0x4af   : > { %v1013_v1 = vsel %vm983_vm2, %v982_v19, 0.0 }
 0x4b0   : > { %v1014_v21 = vadd.f32 %v1013_v1, %v1012_v18 }
 0x4b2   : > { %v1015_v22 = vrot.slane %v1014_v21, 4 }
 0x4b4   : > { %v1016_v24 = vadd.f32 %v1015_v22, %v1014_v21 }
 0x4b6   : > { %v1017_v25 = vrot.slane %v1016_v24, 2 }
 0x4b8   : > { %v1018_v28 = vadd.f32 %v1017_v25, %v1016_v24 }
 0x4ba   : > { %v1019_v29 = vrot.slane %v1018_v28, 1 }
 0x4bc   : > { %v1020_v31 = vadd.f32 %v1019_v29, %v1018_v28 }
 0x4be   : > { %v1031_v32 = vadd.f32 %v1030_v30, %v1020_v31 }
 0x4c0   : > { %1033 = vst.msk [vmem:[%s373_s17] sm:$0x1] %vm1032_vm3, %v1031_v32 }
 0x4c1   : > { %1494 = shalt.err (!%p1491_p11)
}
 0x4c2   : > { %s1495_s26 = scalar_lea.hbm %s1830_s13, 16  ;;  %s1499_s30 = scalar_lea.hbm %s1881_s9, 64 }
 0x4c3   : > { %p1496_p13 = scmp.ne.s32.totalorder %s1830_s13, %s1495_s26  ;;  %p1500_p6 = scmp.lt.u32.totalorder %s1830_s13, %s1881_s9 }
 0x4c4   : > { %p1501_p9 = scmp.lt.u32.totalorder %s1499_s30, %s1495_s26  ;;  %p1503_p10 = scmp.lt.u32.totalorder %s1495_s26, %s1830_s13 }
 0x4c5   : > { %p1497_p5 = pnand %p1496_p13, %p1897_p1 }
 0x4c6   : > { %p1502_p12 = por %p1501_p9, %p1500_p6 }
 0x4c7   : > { %p1498_p0 = pneg %p1497_p5 }
 0x4c8   : > { %p1504_p2 = por %p1503_p10, %p1502_p12 }
 0x4ca   : > { %p1505_p3 = pnand %p1504_p2, %p1498_p0 }
 0x4cc   : > { %1508 = shalt.err (!%p1505_p3)
}
 0x4cd   : > { %1330 = dma.vmem_to_hbm [thread:$0]  (%p1897_p1), %s1832_s18, 16, %s1830_s13, %s1035_s19  }
 0x4ce PF: > { %p1347_p4 = scmp.ge.s32.totalorder %s1551_s14, 2  ;;  %s1059_s17 = sand.u32 1, %s1539_s11  }
 0x4cf   : > { %p1898_p7 = scmp.ne.s32.totalorder %s1889_s21, 0  ;;  %s1060_s23 = scalar_lea.sflag [#allocation5], %s1059_s17 }
 0x4d1   : > { %p1340_p8 = pnand %p1347_p4, %p1898_p7 }
 0x4d3   : > { %1534 = dma.done.wait (!%p1340_p8), %s1060_s23, 16  }
 0x4d4   : > { %1536 = vsyncadd (!%p1340_p8), %s1060_s23, 4294967280  ;;  %s1899_s24 = sld [smem:[#allocation12_spill]]  ;;  %s1900_s13 = sld [smem:[#allocation13_spill]] }
 0x4d5   : > { %p23_p11 = scmp.ge.s32.totalorder %s1639_s16, 6   ;;  %s1901_s11 = smov %s1543_s12 }
 0x4d6   : > { %s1903_s14 = smov %s1639_s16 }
 0x4d7   :  { %25 = sbr.rel (!%p23_p11) target bundleno = 8 (0x8), region = 107 }
 0x4da   : > { %s1902_s12 = smov %s1899_s24 }
 0x4de   :  { %1064 = vsyncpa [#allocation4], 1 }
 0x4df   :  { %1066 = vsyncpa [#allocation4 + $0x1], 1 }
 0x4e0   :  { %1067 = vsyncpa [#allocation7], 1 }
 0x4e1   :  { %1068 = vsyncpa [#allocation5], 1 }
 0x4e2   :  { %1070 = vsyncpa [#allocation5 + $0x1], 1 }

</bundles_post_ra>
